<compile_context>
chip_gen: v7x
topology: tpu7x:2x2x1
jax: 0.10.0
libtpu: 0.0.40
codegen_flags: <defaults>
</compile_context>

<pallas_src>
import functools

import jax
import jax.numpy as jnp
from jax.experimental import pallas as pl
from jax.experimental.pallas import tpu as pltpu

_ROW_TARGET = 8192                   # flattened (b, s) rows per block (review: 4096-8192)
_VMEM_BUDGET = 24 * 1024 * 1024      # conservative across v5e/v6e (128 MiB) and v7x (64 MiB)
_MAX_PACKED_LANES = 512              # lane-packed kernel used when S*D <= this
                                     # (keeps the (L, L) block-diag operators <= 1 MiB each)


# ---------------------------------------------------------------------------
# Kernels
# ---------------------------------------------------------------------------

def generator1_packed_kernel(c_ref, mseg_ref, w1blk_ref, b1_ref, w2f_ref,
                             bcast_ref, fold_ref, gamma_ref, beta_ref, out_ref,
                             *, ln_eps):
    """Lane-packed block: one row = one batch element, lanes = L = S*D.

    c_ref     : (TB, L)  packed C_u slab
    mseg_ref  : (L, L)   block-diag ones(D,D)/D  -> per-segment mean (broadcast)
    w1blk_ref : (L, L)   block-diag (gamma[:,None] * w1)
    b1_ref    : (1, L)   beta @ w1, tiled S times
    w2f_ref   : (L, S)   block-diag w2 column    -> per-segment score
    bcast_ref : (S, L)   block-diag ones(1,D)    -> score broadcast back to lanes
    fold_ref  : (L, D)   stacked identity(D)     -> sum over segments
    gamma_ref, beta_ref : (1, D)
    out_ref   : (TB, D)
    """
    f32 = jnp.float32
    c = c_ref[...]                                                   # (TB, L)
    mseg = mseg_ref[...]

    # LayerNorm over each D-wide segment (biased variance, eps under rsqrt;
    # matches nn.LayerNorm).  Segment mean/var come from block-diagonal MXU
    # matmuls; all elementwise work runs at full 128-lane density.
    mean = jnp.dot(c, mseg, preferred_element_type=f32)              # (TB, L)
    diff = c - mean
    var = jnp.dot(diff * diff, mseg, preferred_element_type=f32)     # (TB, L)
    norm = diff * jax.lax.rsqrt(var + ln_eps)                        # pre-affine LN

    # x = tanh(ln @ w1), with gamma folded into w1 and beta@w1 as a bias row.
    x = jnp.tanh(jnp.dot(norm, w1blk_ref[...], preferred_element_type=f32)
                 + b1_ref[...])                                      # (TB, L)

    # Per-(batch, s) scores and unnormalized softmax over S.  The softmax
    # denominator is a positive per-batch scalar that cancels in the final L2
    # normalize (up to the 1e-12 clamp) and is dropped; the per-row max is kept
    # for exp stability.
    sc = jnp.dot(x, w2f_ref[...], preferred_element_type=f32)        # (TB, S)
    p = jnp.exp(sc - jnp.max(sc, axis=-1, keepdims=True))            # (TB, S)

    # z = gamma * sum_s p_s * norm_s + beta * sum_s p_s   (gamma/beta hoisted).
    pb = jnp.dot(p, bcast_ref[...], preferred_element_type=f32)      # (TB, L)
    zf = jnp.dot(pb * norm, fold_ref[...], preferred_element_type=f32)   # (TB, D)
    z = gamma_ref[...] * zf + beta_ref[...] * jnp.sum(p, axis=-1, keepdims=True)

    # L2 normalize over D (F.normalize, p=2, eps=1e-12).
    # NOTE: the (TB, D) output tile is lane-sparse when D < 128; packing several
    # batch rows per 128-lane store row would need a cross-row relayout and is a
    # secondary effect (output bytes are S x smaller than input) -- skipped.
    nrm = jnp.sqrt(jnp.sum(z * z, axis=-1, keepdims=True))
    out_ref[...] = z / jnp.maximum(nrm, 1e-12)


def generator1_general_kernel(c_ref, w1_ref, b1_ref, w2_ref, gamma_ref, beta_ref,
                              out_ref, *, ln_eps):
    """Generality fallback (used when S*D is too large to lane-pack).

    c_ref : (TB, S, D); w1_ref holds gamma[:,None]*w1; b1_ref holds beta@w1.
    NOTE: the (TB,S,D) <-> (TB*S,D) reshapes are free only when S % 8 == 0
    (sublane tile multiple); otherwise Mosaic materializes a relayout copy --
    acceptable for a fallback path.
    """
    TB, S, D = c_ref.shape
    f32 = jnp.float32
    c = c_ref[...].reshape(TB * S, D)

    mean = jnp.mean(c, axis=-1, keepdims=True)
    diff = c - mean
    var = jnp.mean(diff * diff, axis=-1, keepdims=True)
    norm = diff * jax.lax.rsqrt(var + ln_eps)                        # pre-affine LN

    x = jnp.tanh(jnp.dot(norm, w1_ref[...], preferred_element_type=f32)
                 + b1_ref[...])                                      # (TB*S, D)

    s = jnp.sum(x * w2_ref[...], axis=-1, keepdims=True).reshape(TB, S, 1)
    p = jnp.exp(s - jnp.max(s, axis=1, keepdims=True))               # (TB, S, 1)

    norm3 = norm.reshape(TB, S, D)
    zf = jnp.sum(p * norm3, axis=1)                                  # (TB, D)
    z = gamma_ref[...] * zf + beta_ref[...] * jnp.sum(p, axis=1)

    nrm = jnp.sqrt(jnp.sum(z * z, axis=-1, keepdims=True))
    out_ref[...] = z / jnp.maximum(nrm, 1e-12)


# ---------------------------------------------------------------------------
# Block sizing / wrapper
# ---------------------------------------------------------------------------

def _pick_block_b(B, S, D):
    """Batch elements per block."""
    tb = max(1, _ROW_TARGET // max(S, 1))
    # ~10 live f32 copies of the (TB, S*D) working slab (double-buffered input
    # + elementwise intermediates) must fit the cross-generation VMEM budget.
    per_batch_bytes = 10 * S * D * 4
    tb = min(tb, max(1, _VMEM_BUDGET // per_batch_bytes))
    if B >= 16:
        # Keep the grid length >= 2 so both TensorCores get work on 2-TC parts
        # (v7x); harmless on v5e/v6e (single TC).
        tb = min(tb, max(8, (B // 2) // 8 * 8))
    tb = min(tb, B)
    if tb >= B:
        return B
    return max(8, (tb // 8) * 8)    # keep the (TB, *) tiles 8-aligned


def _vmem_limit_bytes(TB, S, D, packed):
    L = S * D
    slab = TB * L * 4
    if packed:
        ops = (2 * L * L + 2 * L * S + L * D + L + 2 * D) * 4
    else:
        ops = (D * D + 4 * D) * 4
    est = 10 * slab + 2 * ops + 4 * TB * D * 4
    # Explicit budget; clamp well under v7x's 64 MiB physical VMEM.
    return int(min(max(2 * est, 32 * 1024 * 1024), 48 * 1024 * 1024))


def generator1_forward(C_u, w1, w2, gamma, beta, *, ln_eps=1e-12,
                       is_train=False, noise_seed=0, block_b=None,
                       force_general=False):
    """C_u: (B, S, D) float32.  Returns (B, D) float32 (GENERATOR1.forward)."""
    C_u = jnp.asarray(C_u, jnp.float32)
    B, S, D = C_u.shape
    w1 = jnp.asarray(w1, jnp.float32).reshape(D, D)
    w2 = jnp.asarray(w2, jnp.float32).reshape(D)
    gamma = jnp.asarray(gamma, jnp.float32).reshape(D)
    beta = jnp.asarray(beta, jnp.float32).reshape(D)

    if is_train:
        # TODO(synk): fused in-kernel noise (pltpu.prng_seed + stateful_normal)
        # was reverted -- no lowering for prng_seed on this sandbox's interpret
        # path.  0.05 * N(0,1) is added as wrapper glue (same semantics).
        noise = 0.05 * jax.random.normal(jax.random.PRNGKey(noise_seed),
                                         C_u.shape, dtype=jnp.float32)
        C_u = C_u + noise

    if block_b is None:
        TB = _pick_block_b(B, S, D)
    else:
        TB = min(int(block_b), B)
        if TB < B:
            TB = max(8, (TB // 8) * 8)

    num_blocks = -(-B // TB)
    B_pad = num_blocks * TB

    # gamma/beta hoisted out of the hot slab (review item):
    #   ln @ w1            = norm @ (gamma[:,None]*w1) + beta @ w1
    #   sum_s a_s * ln_s   = gamma * sum_s a_s*norm_s + beta * sum_s a_s
    w1_eff = gamma[:, None] * w1                    # (D, D)
    b1_row = (beta @ w1).reshape(1, D)              # (1, D)
    gamma_row = gamma.reshape(1, D)
    beta_row = beta.reshape(1, D)

    use_packed = (not force_general) and (S * D <= _MAX_PACKED_LANES)
    cparams = pltpu.CompilerParams(
        dimension_semantics=("parallel",),
        vmem_limit_bytes=_vmem_limit_bytes(TB, S, D, use_packed))

    if use_packed:
        L = S * D
        # Free row-major reshape: one packed row == one batch element.
        Cp = C_u.reshape(B, L)
        if B_pad != B:
            # Zero-padded rows stay finite through the pipeline (var=0 is
            # guarded by ln_eps; with nonzero beta they produce beta-derived,
            # nonzero junk).  They burn compute but are sliced off below.
            Cp = jnp.pad(Cp, ((0, B_pad - B), (0, 0)))

        eye_s = jnp.eye(S, dtype=jnp.float32)
        mseg = jnp.kron(eye_s, jnp.full((D, D), 1.0 / D, dtype=jnp.float32))   # (L, L)
        w1blk = jnp.kron(eye_s, w1_eff)                                        # (L, L)
        b1_tiled = jnp.tile(b1_row, (1, S))                                    # (1, L)
        w2fold = jnp.kron(eye_s, w2.reshape(D, 1))                             # (L, S)
        bcast = jnp.kron(eye_s, jnp.ones((1, D), jnp.float32))                 # (S, L)
        foldd = jnp.tile(jnp.eye(D, dtype=jnp.float32), (S, 1))                # (L, D)

        kernel = functools.partial(generator1_packed_kernel, ln_eps=ln_eps)
        out = pl.pallas_call(
            kernel,
            out_shape=jax.ShapeDtypeStruct((B_pad, D), jnp.float32),
            grid=(num_blocks,),
            in_specs=[
                pl.BlockSpec((TB, L), lambda b: (b, 0)),     # packed C_u slab
                pl.BlockSpec((L, L), lambda b: (0, 0)),      # segment-mean operator
                pl.BlockSpec((L, L), lambda b: (0, 0)),      # block-diag gamma*w1
                pl.BlockSpec((1, L), lambda b: (0, 0)),      # tiled beta@w1
                pl.BlockSpec((L, S), lambda b: (0, 0)),      # per-segment w2 fold
                pl.BlockSpec((S, L), lambda b: (0, 0)),      # softmax broadcast
                pl.BlockSpec((L, D), lambda b: (0, 0)),      # segment -> D fold
                pl.BlockSpec((1, D), lambda b: (0, 0)),      # gamma
                pl.BlockSpec((1, D), lambda b: (0, 0)),      # beta
            ],
            out_specs=pl.BlockSpec((TB, D), lambda b: (b, 0)),
            compiler_params=cparams,
        )(Cp, mseg, w1blk, b1_tiled, w2fold, bcast, foldd, gamma_row, beta_row)
    else:
        Cg = C_u
        if B_pad != B:
            Cg = jnp.pad(Cg, ((0, B_pad - B), (0, 0), (0, 0)))
        kernel = functools.partial(generator1_general_kernel, ln_eps=ln_eps)
        out = pl.pallas_call(
            kernel,
            out_shape=jax.ShapeDtypeStruct((B_pad, D), jnp.float32),
            grid=(num_blocks,),
            in_specs=[
                pl.BlockSpec((TB, S, D), lambda b: (b, 0, 0)),   # C_u slab
                pl.BlockSpec((D, D), lambda b: (0, 0)),          # gamma*w1
                pl.BlockSpec((1, D), lambda b: (0, 0)),          # beta@w1 row
                pl.BlockSpec((1, D), lambda b: (0, 0)),          # w2 row
                pl.BlockSpec((1, D), lambda b: (0, 0)),          # gamma
                pl.BlockSpec((1, D), lambda b: (0, 0)),          # beta
            ],
            out_specs=pl.BlockSpec((TB, D), lambda b: (b, 0)),
            compiler_params=cparams,
        )(Cg, w1_eff, b1_row, w2.reshape(1, D), gamma_row, beta_row)

    return out[:B] if B_pad != B else out


# ---------------------------------------------------------------------------
# Pure-JAX reference + self-test
# ---------------------------------------------------------------------------

def _reference_jax(C_u, w1, w2, gamma, beta, ln_eps):
    hp = jax.lax.Precision.HIGHEST
    mean = jnp.mean(C_u, axis=-1, keepdims=True)
    var = jnp.mean((C_u - mean) ** 2, axis=-1, keepdims=True)
    ln = (C_u - mean) / jnp.sqrt(var + ln_eps) * gamma + beta
    x = jnp.tanh(jnp.einsum('bsd,de->bse', ln, w1, precision=hp))
    s = jnp.einsum('bsd,d->bs', x, w2, precision=hp)
    attn = jax.nn.softmax(s, axis=1)
    z = jnp.einsum('bs,bsd->bd', attn, ln, precision=hp)
    nrm = jnp.sqrt(jnp.sum(z * z, axis=-1, keepdims=True))
    return z / jnp.maximum(nrm, 1e-12)


if __name__ == "__main__":
    # Config consistent with the module: embedding_size D = 32,
    # layer_norm_eps = 1e-12, initializer_range = 0.02, seq length S = 8.
    B, S, D = 2, 8, 32
    ln_eps = 1e-12
    initializer_range = 0.02

    key = jax.random.PRNGKey(0)
    k_cu, k_w1, k_w2, k_cu2 = jax.random.split(key, 4)

    C_u = jax.random.normal(k_cu, (B, S, D), dtype=jnp.float32)
    w1 = initializer_range * jax.random.normal(k_w1, (D, D), dtype=jnp.float32)
    w2 = initializer_range * jax.random.normal(k_w2, (D,), dtype=jnp.float32)
    gamma = jnp.ones((D,), dtype=jnp.float32)   # nn.LayerNorm weight (default init)
    beta = jnp.zeros((D,), dtype=jnp.float32)   # nn.LayerNorm bias (default init)

    # Eval path (isTrain=False): lane-packed kernel, single block.
    out = jax.block_until_ready(
        generator1_forward(C_u, w1, w2, gamma, beta, ln_eps=ln_eps, is_train=False))
    ref = _reference_jax(C_u, w1, w2, gamma, beta, ln_eps)
    assert out.shape == (B, D)
    assert jnp.allclose(out, ref, atol=2e-3, rtol=2e-3), "mismatch (packed, eval)"

    # Multi-block path with batch padding (B=20, TB=8 -> grid=3, pad to 24).
    B2 = 20
    C_u2 = jax.random.normal(k_cu2, (B2, S, D), dtype=jnp.float32)
    out2 = jax.block_until_ready(
        generator1_forward(C_u2, w1, w2, gamma, beta, ln_eps=ln_eps, block_b=8))
    ref2 = _reference_jax(C_u2, w1, w2, gamma, beta, ln_eps)
    assert out2.shape == (B2, D)
    assert jnp.allclose(out2, ref2, atol=2e-3, rtol=2e-3), "mismatch (multi-block)"

    # Generality fallback kernel (used automatically when S*D is too large to pack).
    out3 = jax.block_until_ready(
        generator1_forward(C_u, w1, w2, gamma, beta, ln_eps=ln_eps,
                           force_general=True))
    assert jnp.allclose(out3, ref, atol=2e-3, rtol=2e-3), "mismatch (general)"

    # Non-default LayerNorm affine params (exercises the gamma/beta hoist math).
    k_g, k_b = jax.random.split(jax.random.PRNGKey(7))
    gamma_r = 1.0 + 0.1 * jax.random.normal(k_g, (D,), dtype=jnp.float32)
    beta_r = 0.1 * jax.random.normal(k_b, (D,), dtype=jnp.float32)
    out4 = jax.block_until_ready(
        generator1_forward(C_u, w1, w2, gamma_r, beta_r, ln_eps=ln_eps))
    ref4 = _reference_jax(C_u, w1, w2, gamma_r, beta_r, ln_eps)
    assert jnp.allclose(out4, ref4, atol=2e-3, rtol=2e-3), "mismatch (affine)"

    # Train path: 0.05 * N(0,1) noise added to C_u before LayerNorm (wrapper glue).
    seed = 42
    out_train = jax.block_until_ready(
        generator1_forward(C_u, w1, w2, gamma, beta, ln_eps=ln_eps,
                           is_train=True, noise_seed=seed))
    noise = 0.05 * jax.random.normal(jax.random.PRNGKey(seed), C_u.shape,
                                     dtype=jnp.float32)
    ref_train = _reference_jax(C_u + noise, w1, w2, gamma, beta, ln_eps)
    assert out_train.shape == (B, D)
    assert jnp.allclose(out_train, ref_train, atol=2e-3, rtol=2e-3), "mismatch (train)"

    print("KERNEL_OK")
</pallas_src>

<mosaic_0001>
module attributes {stable_mosaic.version = 11 : i64} {
  func.func @generator1_packed_kernel(%arg0: i32, %arg1: memref<2x256xf32, #tpu.memory_space<vmem>>, %arg2: memref<256x256xf32, #tpu.memory_space<vmem>>, %arg3: memref<256x256xf32, #tpu.memory_space<vmem>>, %arg4: memref<1x256xf32, #tpu.memory_space<vmem>>, %arg5: memref<256x8xf32, #tpu.memory_space<vmem>>, %arg6: memref<8x256xf32, #tpu.memory_space<vmem>>, %arg7: memref<256x32xf32, #tpu.memory_space<vmem>>, %arg8: memref<1x32xf32, #tpu.memory_space<vmem>>, %arg9: memref<1x32xf32, #tpu.memory_space<vmem>>, %arg10: memref<2x32xf32, #tpu.memory_space<vmem>>) attributes {dimension_semantics = [#tpu.dimension_semantics<parallel>], iteration_bounds = array<i64: 1>, scalar_prefetch = 0 : i64, scratch_operands = 0 : i64, tpu.core_type = #tpu.core_type<tc>, window_params = [{transform_indices = @transform_0, window_bounds = array<i64: 2, 256>}, {pipeline_mode = #tpu.pipeline_mode<synchronous>, transform_indices = @transform_1, window_bounds = array<i64: 256, 256>}, {pipeline_mode = #tpu.pipeline_mode<synchronous>, transform_indices = @transform_2, window_bounds = array<i64: 256, 256>}, {pipeline_mode = #tpu.pipeline_mode<synchronous>, transform_indices = @transform_3, window_bounds = array<i64: 1, 256>}, {pipeline_mode = #tpu.pipeline_mode<synchronous>, transform_indices = @transform_4, window_bounds = array<i64: 256, 8>}, {pipeline_mode = #tpu.pipeline_mode<synchronous>, transform_indices = @transform_5, window_bounds = array<i64: 8, 256>}, {pipeline_mode = #tpu.pipeline_mode<synchronous>, transform_indices = @transform_6, window_bounds = array<i64: 256, 32>}, {pipeline_mode = #tpu.pipeline_mode<synchronous>, transform_indices = @transform_7, window_bounds = array<i64: 1, 32>}, {pipeline_mode = #tpu.pipeline_mode<synchronous>, transform_indices = @transform_8, window_bounds = array<i64: 1, 32>}, {transform_indices = @transform_9, window_bounds = array<i64: 2, 32>}]} {
    %c0 = arith.constant 0 : index
    %c0_0 = arith.constant 0 : index
    %0 = vector.load %arg1[%c0, %c0_0] : memref<2x256xf32, #tpu.memory_space<vmem>>, vector<2x256xf32>
    %c0_1 = arith.constant 0 : index
    %c0_2 = arith.constant 0 : index
    %1 = vector.load %arg2[%c0_1, %c0_2] : memref<256x256xf32, #tpu.memory_space<vmem>>, vector<256x256xf32>
    %cst = arith.constant dense<0.000000e+00> : vector<2x256xf32>
    %2 = tpu.matmul %0, %1, %cst {dimension_numbers = #tpu.dot_dimension_numbers<[1], [0], [0], [1], [0, 0, 1, 1], [], []>} : vector<2x256xf32>, vector<256x256xf32>, vector<2x256xf32> -> vector<2x256xf32>
    %3 = arith.subf %0, %2 : vector<2x256xf32>
    %4 = arith.mulf %3, %3 : vector<2x256xf32>
    %cst_3 = arith.constant dense<0.000000e+00> : vector<2x256xf32>
    %5 = tpu.matmul %4, %1, %cst_3 {dimension_numbers = #tpu.dot_dimension_numbers<[1], [0], [0], [1], [0, 0, 1, 1], [], []>} : vector<2x256xf32>, vector<256x256xf32>, vector<2x256xf32> -> vector<2x256xf32>
    %cst_4 = arith.constant 9.99999996E-13 : f32
    %6 = vector.broadcast %cst_4 : f32 to vector<2x256xf32>
    %7 = arith.addf %5, %6 : vector<2x256xf32>
    %8 = math.rsqrt %7 : vector<2x256xf32>
    %9 = arith.mulf %3, %8 : vector<2x256xf32>
    %c0_5 = arith.constant 0 : index
    %c0_6 = arith.constant 0 : index
    %10 = vector.load %arg3[%c0_5, %c0_6] : memref<256x256xf32, #tpu.memory_space<vmem>>, vector<256x256xf32>
    %cst_7 = arith.constant dense<0.000000e+00> : vector<2x256xf32>
    %11 = tpu.matmul %9, %10, %cst_7 {dimension_numbers = #tpu.dot_dimension_numbers<[1], [0], [0], [1], [0, 0, 1, 1], [], []>} : vector<2x256xf32>, vector<256x256xf32>, vector<2x256xf32> -> vector<2x256xf32>
    %c0_8 = arith.constant 0 : index
    %c0_9 = arith.constant 0 : index
    %12 = vector.load %arg4[%c0_8, %c0_9] : memref<1x256xf32, #tpu.memory_space<vmem>>, vector<1x256xf32>
    %13 = vector.broadcast %12 : vector<1x256xf32> to vector<2x256xf32>
    %14 = arith.addf %11, %13 : vector<2x256xf32>
    %15 = math.tanh %14 : vector<2x256xf32>
    %c0_10 = arith.constant 0 : index
    %c0_11 = arith.constant 0 : index
    %16 = vector.load %arg5[%c0_10, %c0_11] : memref<256x8xf32, #tpu.memory_space<vmem>>, vector<256x8xf32>
    %cst_12 = arith.constant dense<0.000000e+00> : vector<2x8xf32>
    %17 = tpu.matmul %15, %16, %cst_12 {dimension_numbers = #tpu.dot_dimension_numbers<[1], [0], [0], [1], [0, 0, 1, 1], [], []>} : vector<2x256xf32>, vector<256x8xf32>, vector<2x8xf32> -> vector<2x8xf32>
    %cst_13 = arith.constant dense<0xFF800000> : vector<2xf32>
    %18 = vector.multi_reduction <maximumf>, %17, %cst_13 [1] : vector<2x8xf32> to vector<2xf32>
    %19 = vector.shape_cast %18 : vector<2xf32> to vector<2x1xf32>
    %20 = vector.broadcast %19 : vector<2x1xf32> to vector<2x8xf32>
    %21 = arith.subf %17, %20 : vector<2x8xf32>
    %22 = math.exp %21 : vector<2x8xf32>
    %c0_14 = arith.constant 0 : index
    %c0_15 = arith.constant 0 : index
    %23 = vector.load %arg6[%c0_14, %c0_15] : memref<8x256xf32, #tpu.memory_space<vmem>>, vector<8x256xf32>
    %cst_16 = arith.constant dense<0.000000e+00> : vector<2x256xf32>
    %24 = tpu.matmul %22, %23, %cst_16 {dimension_numbers = #tpu.dot_dimension_numbers<[1], [0], [0], [1], [0, 0, 1, 1], [], []>} : vector<2x8xf32>, vector<8x256xf32>, vector<2x256xf32> -> vector<2x256xf32>
    %25 = arith.mulf %24, %9 : vector<2x256xf32>
    %c0_17 = arith.constant 0 : index
    %c0_18 = arith.constant 0 : index
    %26 = vector.load %arg7[%c0_17, %c0_18] : memref<256x32xf32, #tpu.memory_space<vmem>>, vector<256x32xf32>
    %cst_19 = arith.constant dense<0.000000e+00> : vector<2x32xf32>
    %27 = tpu.matmul %25, %26, %cst_19 {dimension_numbers = #tpu.dot_dimension_numbers<[1], [0], [0], [1], [0, 0, 1, 1], [], []>} : vector<2x256xf32>, vector<256x32xf32>, vector<2x32xf32> -> vector<2x32xf32>
    %c0_20 = arith.constant 0 : index
    %c0_21 = arith.constant 0 : index
    %28 = vector.load %arg8[%c0_20, %c0_21] : memref<1x32xf32, #tpu.memory_space<vmem>>, vector<1x32xf32>
    %29 = vector.broadcast %28 : vector<1x32xf32> to vector<2x32xf32>
    %30 = arith.mulf %29, %27 : vector<2x32xf32>
    %c0_22 = arith.constant 0 : index
    %c0_23 = arith.constant 0 : index
    %31 = vector.load %arg9[%c0_22, %c0_23] : memref<1x32xf32, #tpu.memory_space<vmem>>, vector<1x32xf32>
    %cst_24 = arith.constant dense<0.000000e+00> : vector<2xf32>
    %32 = vector.multi_reduction <add>, %22, %cst_24 [1] : vector<2x8xf32> to vector<2xf32>
    %33 = vector.shape_cast %32 : vector<2xf32> to vector<2x1xf32>
    %34 = vector.broadcast %31 : vector<1x32xf32> to vector<2x32xf32>
    %35 = vector.broadcast %33 : vector<2x1xf32> to vector<2x32xf32>
    %36 = arith.mulf %34, %35 : vector<2x32xf32>
    %37 = arith.addf %30, %36 : vector<2x32xf32>
    %38 = arith.mulf %37, %37 : vector<2x32xf32>
    %cst_25 = arith.constant dense<0.000000e+00> : vector<2xf32>
    %39 = vector.multi_reduction <add>, %38, %cst_25 [1] : vector<2x32xf32> to vector<2xf32>
    %40 = vector.shape_cast %39 : vector<2xf32> to vector<2x1xf32>
    %41 = math.sqrt %40 : vector<2x1xf32>
    %cst_26 = arith.constant 9.99999996E-13 : f32
    %42 = vector.broadcast %cst_26 : f32 to vector<2x1xf32>
    %43 = arith.maximumf %41, %42 : vector<2x1xf32>
    %44 = vector.broadcast %43 : vector<2x1xf32> to vector<2x32xf32>
    %45 = arith.divf %37, %44 : vector<2x32xf32>
    %c0_27 = arith.constant 0 : index
    %c0_28 = arith.constant 0 : index
    %46 = vector.load %arg10[%c0_27, %c0_28] : memref<2x32xf32, #tpu.memory_space<vmem>>, vector<2x32xf32>
    tpu.vector_store %arg10[%c0_27, %c0_28], %45 {strides = array<i32>} : memref<2x32xf32, #tpu.memory_space<vmem>>, vector<2x32xf32>,
    return
  }
  func.func @transform_0(%arg0: i32) -> (i32, i32) {
    %c0_i32 = arith.constant 0 : i32
    %c0_i32_0 = arith.constant 0 : i32
    return %arg0, %c0_i32 : i32, i32
  }
  func.func @transform_1(%arg0: i32) -> (i32, i32) {
    %c0_i32 = arith.constant 0 : i32
    %c0_i32_0 = arith.constant 0 : i32
    %c0_i32_1 = arith.constant 0 : i32
    return %c0_i32, %c0_i32_0 : i32, i32
  }
  func.func @transform_2(%arg0: i32) -> (i32, i32) {
    %c0_i32 = arith.constant 0 : i32
    %c0_i32_0 = arith.constant 0 : i32
    %c0_i32_1 = arith.constant 0 : i32
    return %c0_i32, %c0_i32_0 : i32, i32
  }
  func.func @transform_3(%arg0: i32) -> (i32, i32) {
    %c0_i32 = arith.constant 0 : i32
    %c0_i32_0 = arith.constant 0 : i32
    %c0_i32_1 = arith.constant 0 : i32
    return %c0_i32, %c0_i32_0 : i32, i32
  }
  func.func @transform_4(%arg0: i32) -> (i32, i32) {
    %c0_i32 = arith.constant 0 : i32
    %c0_i32_0 = arith.constant 0 : i32
    %c0_i32_1 = arith.constant 0 : i32
    return %c0_i32, %c0_i32_0 : i32, i32
  }
  func.func @transform_5(%arg0: i32) -> (i32, i32) {
    %c0_i32 = arith.constant 0 : i32
    %c0_i32_0 = arith.constant 0 : i32
    %c0_i32_1 = arith.constant 0 : i32
    return %c0_i32, %c0_i32_0 : i32, i32
  }
  func.func @transform_6(%arg0: i32) -> (i32, i32) {
    %c0_i32 = arith.constant 0 : i32
    %c0_i32_0 = arith.constant 0 : i32
    %c0_i32_1 = arith.constant 0 : i32
    return %c0_i32, %c0_i32_0 : i32, i32
  }
  func.func @transform_7(%arg0: i32) -> (i32, i32) {
    %c0_i32 = arith.constant 0 : i32
    %c0_i32_0 = arith.constant 0 : i32
    %c0_i32_1 = arith.constant 0 : i32
    return %c0_i32, %c0_i32_0 : i32, i32
  }
  func.func @transform_8(%arg0: i32) -> (i32, i32) {
    %c0_i32 = arith.constant 0 : i32
    %c0_i32_0 = arith.constant 0 : i32
    %c0_i32_1 = arith.constant 0 : i32
    return %c0_i32, %c0_i32_0 : i32, i32
  }
  func.func @transform_9(%arg0: i32) -> (i32, i32) {
    %c0_i32 = arith.constant 0 : i32
    %c0_i32_0 = arith.constant 0 : i32
    return %arg0, %c0_i32 : i32, i32
  }
}

</mosaic_0001>

<bundles_post_ra>
// kernel: tpu_custom_call.1
= control target key start
LH: loop header
LB: loop body
LE: loop exit
PB: predicated region body
PF: predicated region fallthrough
CT: control target
= control target key end

     0   :  { %14 = vsyncpa [#allocation3], 0  ;;  %s1723_s0 = inlined_call_operand.vmem [shape: f32[2,256], index: 0, kind: input, shape index: {}]   ;;  %s1724_s1 = inlined_call_operand.vmem [shape: f32[256,256], index: 1, kind: input, shape index: {}]   ;;  %s1725_s2 = inlined_call_operand.hbm [shape: f32[256,256], index: 2, kind: input, shape index: {}]   ;;  %s1726_s3 = inlined_call_operand.vmem [shape: f32[1,256], index: 3, kind: input, shape index: {}]   ;;  %s1727_s4 = inlined_call_operand.vmem [shape: f32[256,8], index: 4, kind: input, shape index: {}]   ;;  %s1728_s5 = inlined_call_operand.vmem [shape: f32[8,256], index: 5, kind: input, shape index: {}]   ;;  %s1729_s6 = inlined_call_operand.vmem [shape: f32[256,32], index: 6, kind: input, shape index: {}]   ;;  %s1730_s7 = inlined_call_operand.vmem [shape: f32[1,32], index: 7, kind: input, shape index: {}]   ;;  %s1731_s8 = inlined_call_operand.vmem [shape: f32[1,32], index: 8, kind: input, shape index: {}]   ;;  %s1732_s9 = inlined_call_operand.hbm [shape: f32[2,32], index: 9, kind: output, shape index: {}]  }
   0x1   :  { %15 = vsyncpa [#allocation4], 0  ;;  %s1201_s30 = smov [#allocation2]   ;;  %s1153_s13 = scalar_lea.hbm %s1725_s2, 8192 }
   0x2   :  { %s25_s10 = sshll.u32 %s1201_s30, 4  ;;  %p1154_p0 = scmp.ne.s32.totalorder %s1725_s2, %s1153_s13  ;;  %s26_s10 = int_to_ptr.vmem [resolvable:$true] %s25_s10 }
   0x3   :  { %p1157_p1 = scmp.lt.u32.totalorder %s1153_s13, %s1725_s2 }
   0x5   :  { %p1159_p2 = pnand %p1157_p1, %p1154_p0 }
   0x7   :  { %1162 = shalt.err (!%p1159_p2)
}
   0x8   :  { %s1163_s18 = scalar_lea.vmem %s26_s10, 8192  ;;  %p1168_p4 = scmp.lt.s32.totalorder %s26_s10, %s26_s10 }
   0x9   :  { %p1164_p3 = scmp.ne.s32.totalorder %s26_s10, %s1163_s18  ;;  %p1169_p5 = scmp.lt.s32.totalorder %s1163_s18, %s1163_s18 }
   0xb   :  { %p1170_p6 = por %p1169_p5, %p1168_p4 }
   0xd   :  { %p1171_p7 = pnand %p1170_p6, %p1164_p3 }
   0xf   :  { %1174 = shalt.err (!%p1171_p7)
}
  0x10   :  { %s1202_s19 = smov 256   ;;  %s1203_s20 = smov 16  }
  0x11   :  { %31 = dma.hbm_to_vmem [thread:$0]  %s1725_s2, 8192, %s26_s10, [#allocation3], %s1202_s19, %s1202_s19, %s1203_s20  }
  0x12   :  { %1197 = dma.done.wait [#allocation3], 8192  }
  0x13   :  { %1198 = vsyncadd [#allocation3], 4294959104  ;;  %v49_v0 = vld [vmem:[%s1724_s1 + $0x8] sm:$0xff]  ;;  %v51_v1 = vld [vmem:[%s1724_s1 + $0x18] sm:$0xff]  ;;  %v1204_v25 = vmov 1983009808   ;;  %v116_v27 = vlaneseq }
  0x14   :  { %v48_v2 = vld [vmem:[%s1724_s1] sm:$0xff]  ;;  %v877_v3 = vpack.c.bf16 %v51_v1, %v49_v0  ;;  %v50_v4 = vld [vmem:[%s1724_s1 + $0x10] sm:$0xff]  ;;  %v53_v5 = vld [vmem:[%s1724_s1 + $0x28] sm:$0xff]  ;;  %v114_v26 = vunpack.c.l.s4 %v1204_v25  ;;  %vm565_vm0 = vcmask 58368   ;;  %vm574_vm1 = vcmask 64512  }
  0x15   :  { %v55_v6 = vld [vmem:[%s1724_s1 + $0x38] sm:$0xff]  ;;  %v879_v7 = vpack.c.bf16 %v50_v4, %v48_v2  ;;  %v52_v9 = vld [vmem:[%s1724_s1 + $0x20] sm:$0xff]  ;;  %v54_v10 = vld [vmem:[%s1724_s1 + $0x30] sm:$0xff]  ;;  %v1335_v35 = vshrl.u32 %v116_v27, 7  ;;  %vm774_vm2 = vcmask 254976  }
  0x16   :  { %v881_v8 = vpack.c.bf16 %v55_v6, %v53_v5  ;;  %v57_v11 = vld [vmem:[%s1724_s1 + $0x48] sm:$0xff]  ;;  %878 = vmatprep.subr.bf16.mxu0 %v877_v3  ;;  %v59_v12 = vld [vmem:[%s1724_s1 + $0x58] sm:$0xff]  ;;  %942 = vmatprep.subr.bf16.mxu1 %v877_v3  ;;  %v883_v13 = vpack.c.bf16 %v54_v10, %v52_v9  ;;  %v56_v15 = vld [vmem:[%s1724_s1 + $0x40] sm:$0xff]  ;;  %v115_v34 = vunpack.c.0.s8 %v114_v26 }
  0x17   :  { %880 = vmatpush1.bf16.msra.mxu0 %v879_v7  ;;  %944 = vmatpush1.bf16.msra.mxu1 %v879_v7  ;;  %v885_v14 = vpack.c.bf16 %v59_v12, %v57_v11  ;;  %v58_v16 = vld [vmem:[%s1724_s1 + $0x50] sm:$0xff]  ;;  %v61_v17 = vld [vmem:[%s1724_s1 + $0x68] sm:$0xff]  ;;  %v63_v18 = vld [vmem:[%s1724_s1 + $0x78] sm:$0xff] }
  0x18   :  { %882 = vmatprep.subr.bf16.mxu0 %v881_v8  ;;  %946 = vmatprep.subr.bf16.mxu1 %v881_v8  ;;  %v887_v19 = vpack.c.bf16 %v58_v16, %v56_v15  ;;  %v889_v20 = vpack.c.bf16 %v63_v18, %v61_v17  ;;  %v60_v21 = vld [vmem:[%s1724_s1 + $0x60] sm:$0xff]  ;;  %v62_v22 = vld [vmem:[%s1724_s1 + $0x70] sm:$0xff]  ;;  %v65_v23 = vld [vmem:[%s1724_s1 + $0x88] sm:$0xff]  ;;  %v1350_v42 = vsub.s32 %v115_v34, %v1335_v35 }
  0x19   :  { %v67_v24 = vld [vmem:[%s1724_s1 + $0x98] sm:$0xff]  ;;  %v891_v28 = vpack.c.bf16 %v62_v22, %v60_v21  ;;  %v64_v30 = vld [vmem:[%s1724_s1 + $0x80] sm:$0xff]  ;;  %v66_v31 = vld [vmem:[%s1724_s1 + $0x90] sm:$0xff] }
  0x1a   :  { %v893_v29 = vpack.c.bf16 %v67_v24, %v65_v23  ;;  %v69_v32 = vld [vmem:[%s1724_s1 + $0xa8] sm:$0xff]  ;;  %v71_v33 = vld [vmem:[%s1724_s1 + $0xb8] sm:$0xff]  ;;  %v895_v36 = vpack.c.bf16 %v66_v31, %v64_v30  ;;  %v68_v38 = vld [vmem:[%s1724_s1 + $0xa0] sm:$0xff] }
  0x1b   :  { %884 = vmatpush1.bf16.msra.mxu0 %v883_v13  ;;  %948 = vmatpush1.bf16.msra.mxu1 %v883_v13  ;;  %v897_v37 = vpack.c.bf16 %v71_v33, %v69_v32  ;;  %v70_v39 = vld [vmem:[%s1724_s1 + $0xb0] sm:$0xff]  ;;  %v73_v40 = vld [vmem:[%s1724_s1 + $0xc8] sm:$0xff]  ;;  %v75_v41 = vld [vmem:[%s1724_s1 + $0xd8] sm:$0xff] }
  0x1c   :  { %886 = vmatprep.subr.bf16.mxu0 %v885_v14  ;;  %950 = vmatprep.subr.bf16.mxu1 %v885_v14  ;;  %v899_v43 = vpack.c.bf16 %v70_v39, %v68_v38  ;;  %v901_v44 = vpack.c.bf16 %v75_v41, %v73_v40  ;;  %v72_v45 = vld [vmem:[%s1724_s1 + $0xc0] sm:$0xff]  ;;  %v74_v46 = vld [vmem:[%s1724_s1 + $0xd0] sm:$0xff]  ;;  %v77_v48 = vld [vmem:[%s1724_s1 + $0xe8] sm:$0xff] }
  0x1d   :  { %v1361_v47 = vld [vmem:[%s1723_s0] sm:$0xf]  ;;  %v79_v49 = vld [vmem:[%s1724_s1 + $0xf8] sm:$0xff]  ;;  %v903_v51 = vpack.c.bf16 %v74_v46, %v72_v45  ;;  %v78_v55 = vld [vmem:[%s1724_s1 + $0xf0] sm:$0xff] }
  0x1e   :  { %v1371_v50 = vrot.slane %v1361_v47, %v1350_v42  ;;  %v905_v53 = vpack.c.bf16 %v79_v49, %v77_v48  ;;  %v76_v54 = vld [vmem:[%s1724_s1 + $0xe0] sm:$0xff]  ;;  %v81_v56 = vld [vmem:[%s1724_s1 + $0x108] sm:$0xff]  ;;  %v83_v57 = vld [vmem:[%s1724_s1 + $0x118] sm:$0xff] }
  0x1f   :  { %888 = vmatpush1.bf16.msra.mxu0 %v887_v19  ;;  %952 = vmatpush1.bf16.msra.mxu1 %v887_v19  ;;  %v907_v58 = vpack.c.bf16 %v78_v55, %v76_v54  ;;  %v909_v59 = vpack.c.bf16 %v83_v57, %v81_v56  ;;  %v80_v60 = vld [vmem:[%s1724_s1 + $0x100] sm:$0xff]  ;;  %v82_v61 = vld [vmem:[%s1724_s1 + $0x110] sm:$0xff]  ;;  %v85_v62 = vld [vmem:[%s1724_s1 + $0x128] sm:$0xff] }
  0x20   :  { %890 = vmatprep.subr.bf16.mxu0 %v889_v20  ;;  %954 = vmatprep.subr.bf16.mxu1 %v889_v20  ;;  %v120_v52 = vcombine.high %v1371_v50, %v1371_v50  ;;  %v87_v63 = vld [vmem:[%s1724_s1 + $0x138] sm:$0xff]  ;;  %v911_v0 = vpack.c.bf16 %v82_v61, %v80_v60  ;;  %v84_v2 = vld [vmem:[%s1724_s1 + $0x120] sm:$0xff]  ;;  %v86_v3 = vld [vmem:[%s1724_s1 + $0x130] sm:$0xff] }
  0x21   :  { %v913_v1 = vpack.c.bf16 %v87_v63, %v85_v62  ;;  %v89_v4 = vld [vmem:[%s1724_s1 + $0x148] sm:$0xff]  ;;  %v91_v5 = vld [vmem:[%s1724_s1 + $0x158] sm:$0xff]  ;;  %v915_v6 = vpack.c.bf16 %v86_v3, %v84_v2  ;;  %v88_v8 = vld [vmem:[%s1724_s1 + $0x140] sm:$0xff] }
  0x22   :  { %187 = vmatprep.mubr.f32.mxu0 %v120_v52  ;;  %v917_v7 = vpack.c.bf16 %v91_v5, %v89_v4  ;;  %v90_v9 = vld [vmem:[%s1724_s1 + $0x150] sm:$0xff]  ;;  %v93_v10 = vld [vmem:[%s1724_s1 + $0x168] sm:$0xff]  ;;  %v95_v11 = vld [vmem:[%s1724_s1 + $0x178] sm:$0xff] }
  0x23   :  { %892 = vmatpush1.bf16.msra.mxu0 %v891_v28  ;;  %956 = vmatpush1.bf16.msra.mxu1 %v891_v28  ;;  %v919_v12 = vpack.c.bf16 %v90_v9, %v88_v8  ;;  %v921_v13 = vpack.c.bf16 %v95_v11, %v93_v10  ;;  %v92_v14 = vld [vmem:[%s1724_s1 + $0x160] sm:$0xff]  ;;  %v94_v15 = vld [vmem:[%s1724_s1 + $0x170] sm:$0xff]  ;;  %v97_v16 = vld [vmem:[%s1724_s1 + $0x188] sm:$0xff] }
  0x24   :  { %894 = vmatprep.subr.bf16.mxu0 %v893_v29  ;;  %958 = vmatprep.subr.bf16.mxu1 %v893_v29  ;;  %v99_v17 = vld [vmem:[%s1724_s1 + $0x198] sm:$0xff]  ;;  %v923_v18 = vpack.c.bf16 %v94_v15, %v92_v14  ;;  %v96_v20 = vld [vmem:[%s1724_s1 + $0x180] sm:$0xff]  ;;  %v98_v21 = vld [vmem:[%s1724_s1 + $0x190] sm:$0xff] }
  0x25   :  { %v925_v19 = vpack.c.bf16 %v99_v17, %v97_v16  ;;  %v101_v22 = vld [vmem:[%s1724_s1 + $0x1a8] sm:$0xff]  ;;  %v103_v23 = vld [vmem:[%s1724_s1 + $0x1b8] sm:$0xff]  ;;  %v927_v24 = vpack.c.bf16 %v98_v21, %v96_v20  ;;  %v100_v26 = vld [vmem:[%s1724_s1 + $0x1a0] sm:$0xff] }
  0x26   :  { %v929_v25 = vpack.c.bf16 %v103_v23, %v101_v22  ;;  %v102_v27 = vld [vmem:[%s1724_s1 + $0x1b0] sm:$0xff]  ;;  %v105_v28 = vld [vmem:[%s1724_s1 + $0x1c8] sm:$0xff]  ;;  %v107_v29 = vld [vmem:[%s1724_s1 + $0x1d8] sm:$0xff] }
  0x27   :  { %896 = vmatpush1.bf16.msra.mxu0 %v895_v36  ;;  %960 = vmatpush1.bf16.msra.mxu1 %v895_v36  ;;  %v931_v30 = vpack.c.bf16 %v102_v27, %v100_v26  ;;  %v933_v31 = vpack.c.bf16 %v107_v29, %v105_v28  ;;  %v104_v32 = vld [vmem:[%s1724_s1 + $0x1c0] sm:$0xff]  ;;  %v106_v33 = vld [vmem:[%s1724_s1 + $0x1d0] sm:$0xff]  ;;  %v109_v34 = vld [vmem:[%s1724_s1 + $0x1e8] sm:$0xff] }
  0x28   :  { %898 = vmatprep.subr.bf16.mxu0 %v897_v37  ;;  %962 = vmatprep.subr.bf16.mxu1 %v897_v37  ;;  %v111_v36 = vld [vmem:[%s1724_s1 + $0x1f8] sm:$0xff]  ;;  %v935_v37 = vpack.c.bf16 %v106_v33, %v104_v32  ;;  %v108_v39 = vld [vmem:[%s1724_s1 + $0x1e0] sm:$0xff]  ;;  %v110_v40 = vld [vmem:[%s1724_s1 + $0x1f0] sm:$0xff] }
  0x29   :  { %v937_v38 = vpack.c.bf16 %v111_v36, %v109_v34  ;;  %v939_v41 = vpack.c.bf16 %v110_v40, %v108_v39  ;;  %v303_v45 = vld [vmem:[#allocation2] sm:$0xff]  ;;  %v305_v48 = vld [vmem:[#allocation2 + $0x10] sm:$0xff]  ;;  %v308_v49 = vld [vmem:[#allocation2 + $0x28] sm:$0xff] }
  0x2a   :  { %v1007_v52 = vpack.c.bf16 %v305_v48, %v303_v45  ;;  %v307_v54 = vld [vmem:[#allocation2 + $0x20] sm:$0xff]  ;;  %v309_v55 = vld [vmem:[#allocation2 + $0x30] sm:$0xff]  ;;  %v312_v56 = vld [vmem:[#allocation2 + $0x48] sm:$0xff] }
  0x2b   :  { %900 = vmatpush1.bf16.msra.mxu0 %v899_v43  ;;  %964 = vmatpush1.bf16.msra.mxu1 %v899_v43  ;;  %v304_v43 = vld [vmem:[#allocation2 + $0x8] sm:$0xff]  ;;  %v314_v57 = vld [vmem:[#allocation2 + $0x58] sm:$0xff]  ;;  %v311_v60 = vld [vmem:[#allocation2 + $0x40] sm:$0xff] }
  0x2c   :  { %902 = vmatprep.subr.bf16.mxu0 %v901_v44  ;;  %966 = vmatprep.subr.bf16.mxu1 %v901_v44  ;;  %v306_v44 = vld [vmem:[#allocation2 + $0x18] sm:$0xff]  ;;  %v316_v61 = vld [vmem:[#allocation2 + $0x68] sm:$0xff]  ;;  %v317_v2 = vld [vmem:[#allocation2 + $0x70] sm:$0xff] }
  0x2d   :  { %v1005_v46 = vpack.c.bf16 %v306_v44, %v304_v43  ;;  %v318_v62 = vld [vmem:[#allocation2 + $0x78] sm:$0xff]  ;;  %v320_v3 = vld [vmem:[#allocation2 + $0x88] sm:$0xff]  ;;  %v321_v8 = vld [vmem:[#allocation2 + $0x90] sm:$0xff] }
  0x2e   :  { %v322_v4 = vld [vmem:[#allocation2 + $0x98] sm:$0xff]  ;;  %v324_v9 = vld [vmem:[#allocation2 + $0xa8] sm:$0xff]  ;;  %v325_v14 = vld [vmem:[#allocation2 + $0xb0] sm:$0xff] }
  0x2f   :  { %904 = vmatpush1.bf16.msra.mxu0 %v903_v51  ;;  %968 = vmatpush1.bf16.msra.mxu1 %v903_v51  ;;  %v310_v51 = vld [vmem:[#allocation2 + $0x38] sm:$0xff]  ;;  %v328_v15 = vld [vmem:[#allocation2 + $0xc8] sm:$0xff]  ;;  %v329_v20 = vld [vmem:[#allocation2 + $0xd0] sm:$0xff] }
  0x30   :  { %906 = vmatprep.subr.bf16.mxu0 %v905_v53  ;;  %970 = vmatprep.subr.bf16.mxu1 %v905_v53  ;;  %v1009_v53 = vpack.c.bf16 %v310_v51, %v308_v49  ;;  %v326_v10 = vld [vmem:[#allocation2 + $0xb8] sm:$0xff]  ;;  %v332_v21 = vld [vmem:[#allocation2 + $0xe8] sm:$0xff]  ;;  %v333_v26 = vld [vmem:[#allocation2 + $0xf0] sm:$0xff] }
  0x31   :  { %v330_v16 = vld [vmem:[#allocation2 + $0xd8] sm:$0xff]  ;;  %v336_v27 = vld [vmem:[#allocation2 + $0x108] sm:$0xff]  ;;  %v337_v32 = vld [vmem:[#allocation2 + $0x110] sm:$0xff] }
  0x32   :  { %v334_v22 = vld [vmem:[#allocation2 + $0xf8] sm:$0xff]  ;;  %v340_v33 = vld [vmem:[#allocation2 + $0x128] sm:$0xff]  ;;  %v341_v39 = vld [vmem:[#allocation2 + $0x130] sm:$0xff] }
  0x33   :  { %908 = vmatpush1.bf16.msra.mxu0 %v907_v58  ;;  %972 = vmatpush1.bf16.msra.mxu1 %v907_v58  ;;  %v1011_v58 = vpack.c.bf16 %v309_v55, %v307_v54  ;;  %v338_v28 = vld [vmem:[#allocation2 + $0x118] sm:$0xff]  ;;  %v343_v55 = vld [vmem:[#allocation2 + $0x140] sm:$0xff] }
  0x34   :  { %910 = vmatprep.subr.bf16.mxu0 %v909_v59  ;;  %974 = vmatprep.subr.bf16.mxu1 %v909_v59  ;;  %v1013_v59 = vpack.c.bf16 %v314_v57, %v312_v56  ;;  %v342_v34 = vld [vmem:[#allocation2 + $0x138] sm:$0xff]  ;;  %v345_v56 = vld [vmem:[#allocation2 + $0x150] sm:$0xff] }
  0x35   :  { %v1047_v57 = vpack.c.bf16 %v345_v56, %v343_v55 }
  0x37   :  { %912 = vmatpush1.bf16.msra.mxu0 %v911_v0  ;;  %976 = vmatpush1.bf16.msra.mxu1 %v911_v0  ;;  %v1017_v0 = vpack.c.bf16 %v318_v62, %v316_v61  ;;  %v352_v62 = vld [vmem:[#allocation2 + $0x188] sm:$0xff] }
  0x38   :  { %914 = vmatprep.subr.bf16.mxu0 %v913_v1  ;;  %978 = vmatprep.subr.bf16.mxu1 %v913_v1  ;;  %v315_v1 = vld [vmem:[#allocation2 + $0x60] sm:$0xff] }
  0x39   :  { %v1019_v5 = vpack.c.bf16 %v317_v2, %v315_v1  ;;  %v351_v1 = vld [vmem:[#allocation2 + $0x180] sm:$0xff]  ;;  %v353_v2 = vld [vmem:[#allocation2 + $0x190] sm:$0xff] }
  0x3b   :  { %916 = vmatpush1.bf16.msra.mxu0 %v915_v6  ;;  %980 = vmatpush1.bf16.msra.mxu1 %v915_v6  ;;  %v1021_v6 = vpack.c.bf16 %v322_v4, %v320_v3  ;;  %v1055_v3 = vpack.c.bf16 %v353_v2, %v351_v1  ;;  %v356_v4 = vld [vmem:[#allocation2 + $0x1a8] sm:$0xff]  ;;  %v490_v1 = vld [vmem:[%s1727_s4 + $0xd8] sm:$0xff] }
  0x3c   :  { %918 = vmatprep.subr.bf16.mxu0 %v917_v7  ;;  %982 = vmatprep.subr.bf16.mxu1 %v917_v7  ;;  %v319_v7 = vld [vmem:[#allocation2 + $0x80] sm:$0xff] }
  0x3d   :  { %v1023_v11 = vpack.c.bf16 %v321_v8, %v319_v7  ;;  %v355_v7 = vld [vmem:[#allocation2 + $0x1a0] sm:$0xff]  ;;  %v357_v8 = vld [vmem:[#allocation2 + $0x1b0] sm:$0xff] }
  0x3f   :  { %920 = vmatpush1.bf16.msra.mxu0 %v919_v12  ;;  %984 = vmatpush1.bf16.msra.mxu1 %v919_v12  ;;  %v1025_v12 = vpack.c.bf16 %v326_v10, %v324_v9  ;;  %v1059_v9 = vpack.c.bf16 %v357_v8, %v355_v7  ;;  %v360_v10 = vld [vmem:[#allocation2 + $0x1c8] sm:$0xff]  ;;  %v475_v8 = vld [vmem:[%s1727_s4 + $0x60] sm:$0xff] }
  0x40   :  { %922 = vmatprep.subr.bf16.mxu0 %v921_v13  ;;  %986 = vmatprep.subr.bf16.mxu1 %v921_v13  ;;  %v323_v13 = vld [vmem:[#allocation2 + $0xa0] sm:$0xff]  ;;  %v492_v7 = vld [vmem:[%s1727_s4 + $0xe8] sm:$0xff] }
  0x41   :  { %v1027_v17 = vpack.c.bf16 %v325_v14, %v323_v13  ;;  %v361_v14 = vld [vmem:[#allocation2 + $0x1d0] sm:$0xff] }
  0x43   :  { %924 = vmatpush1.bf16.msra.mxu0 %v923_v18  ;;  %988 = vmatpush1.bf16.msra.mxu1 %v923_v18  ;;  %v1029_v18 = vpack.c.bf16 %v330_v16, %v328_v15  ;;  %v364_v15 = vld [vmem:[#allocation2 + $0x1e8] sm:$0xff]  ;;  %v366_v16 = vld [vmem:[#allocation2 + $0x1f8] sm:$0xff] }
  0x44   :  { %926 = vmatprep.subr.bf16.mxu0 %v925_v19  ;;  %990 = vmatprep.subr.bf16.mxu1 %v925_v19  ;;  %v327_v19 = vld [vmem:[#allocation2 + $0xc0] sm:$0xff] }
  0x45   :  { %v1031_v23 = vpack.c.bf16 %v329_v20, %v327_v19  ;;  %v363_v19 = vld [vmem:[#allocation2 + $0x1e0] sm:$0xff]  ;;  %v365_v20 = vld [vmem:[#allocation2 + $0x1f0] sm:$0xff] }
  0x47   :  { %928 = vmatpush1.bf16.msra.mxu0 %v927_v24  ;;  %992 = vmatpush1.bf16.msra.mxu1 %v927_v24  ;;  %v1033_v24 = vpack.c.bf16 %v334_v22, %v332_v21  ;;  %v1067_v21 = vpack.c.bf16 %v365_v20, %v363_v19  ;;  %v479_v22 = vld [vmem:[%s1727_s4 + $0x80] sm:$0xff]  ;;  %v375_v20 = vsub.s32 1, %v1335_v35 }
  0x48   :  { %930 = vmatprep.subr.bf16.mxu0 %v929_v25  ;;  %994 = vmatprep.subr.bf16.mxu1 %v929_v25  ;;  %v331_v25 = vld [vmem:[#allocation2 + $0xe0] sm:$0xff] }
  0x49   :  { %v1035_v29 = vpack.c.bf16 %v333_v26, %v331_v25  ;;  %v464_v26 = vld [vmem:[%s1727_s4 + $0x8] sm:$0xff]  ;;  %v367_v19 = vld [vmem:[%s1726_s3] sm:$0x3] }
  0x4b   :  { %932 = vmatpush1.bf16.msra.mxu0 %v931_v30  ;;  %996 = vmatpush1.bf16.msra.mxu1 %v931_v30  ;;  %v1037_v30 = vpack.c.bf16 %v338_v28, %v336_v27  ;;  %v481_v27 = vld [vmem:[%s1727_s4 + $0x90] sm:$0xff]  ;;  %v482_v28 = vld [vmem:[%s1727_s4 + $0x98] sm:$0xff] }
  0x4c   :  { %934 = vmatprep.subr.bf16.mxu0 %v933_v31  ;;  %998 = vmatprep.subr.bf16.mxu1 %v933_v31  ;;  %v335_v31 = vld [vmem:[#allocation2 + $0x100] sm:$0xff] }
  0x4d   :  { %v1039_v36 = vpack.c.bf16 %v337_v32, %v335_v31  ;;  %v465_v31 = vld [vmem:[%s1727_s4 + $0x10] sm:$0xff]  ;;  %v466_v32 = vld [vmem:[%s1727_s4 + $0x18] sm:$0xff] }
  0x4f   :  { %936 = vmatpush1.bf16.msra.mxu0 %v935_v37  ;;  %1000 = vmatpush1.bf16.msra.mxu1 %v935_v37  ;;  %v1041_v37 = vpack.c.bf16 %v342_v34, %v340_v33  ;;  %v483_v33 = vld [vmem:[%s1727_s4 + $0xa0] sm:$0xff]  ;;  %v484_v34 = vld [vmem:[%s1727_s4 + $0xa8] sm:$0xff] }
  0x50   :  { %938 = vmatprep.subr.bf16.mxu0 %v937_v38  ;;  %1002 = vmatprep.subr.bf16.mxu1 %v937_v38  ;;  %v339_v38 = vld [vmem:[#allocation2 + $0x120] sm:$0xff] }
  0x51   :  { %v1043_v40 = vpack.c.bf16 %v341_v39, %v339_v38  ;;  %v467_v38 = vld [vmem:[%s1727_s4 + $0x20] sm:$0xff]  ;;  %v468_v39 = vld [vmem:[%s1727_s4 + $0x28] sm:$0xff] }
  0x53   :  { %940 = vmatpush1.bf16.msra.mxu0 %v939_v41  ;;  %1004 = vmatpush1.bf16.msra.mxu1 %v939_v41 }
  0x54   :  { %1006 = vmatprep.subr.bf16.mxu0 %v1005_v46 }
  0x56   :  { %188 = vmatmul.mubr.f32.vlgmr.msra.gmra.mrb[0].mxu0 %v1371_v50  ;;  %v313_v50 = vld [vmem:[#allocation2 + $0x50] sm:$0xff] }
  0x57   :  { %1008 = vmatpush1.bf16.msra.mxu0 %v1007_v52  ;;  %v1015_v63 = vpack.c.bf16 %v313_v50, %v311_v60  ;;  %v344_v52 = vld [vmem:[#allocation2 + $0x148] sm:$0xff]  ;;  %v347_v60 = vld [vmem:[#allocation2 + $0x160] sm:$0xff]  ;;  %v349_v50 = vld [vmem:[#allocation2 + $0x170] sm:$0xff] }
  0x58   :  { %1010 = vmatprep.subr.bf16.mxu0 %v1009_v53  ;;  %v346_v53 = vld [vmem:[#allocation2 + $0x158] sm:$0xff]  ;;  %v1051_v61 = vpack.c.bf16 %v349_v50, %v347_v60  ;;  %v487_v50 = vld [vmem:[%s1727_s4 + $0xc0] sm:$0xff] }
  0x59   :  { %v1045_v54 = vpack.c.bf16 %v346_v53, %v344_v52 }
  0x5b   :  { %1012 = vmatpush1.bf16.msra.mxu0 %v1011_v58  ;;  %v348_v58 = vld [vmem:[#allocation2 + $0x168] sm:$0xff] }
  0x5c   :  { %1014 = vmatprep.subr.bf16.mxu0 %v1013_v59  ;;  %v350_v59 = vld [vmem:[#allocation2 + $0x178] sm:$0xff] }
  0x5f   :  { %1016 = vmatpush1.bf16.msra.mxu0 %v1015_v63  ;;  %v354_v63 = vld [vmem:[#allocation2 + $0x198] sm:$0xff] }
  0x60   :  { %1018 = vmatprep.subr.bf16.mxu0 %v1017_v0  ;;  %v1053_v0 = vpack.c.bf16 %v354_v63, %v352_v62  ;;  %v472_v62 = vld [vmem:[%s1727_s4 + $0x48] sm:$0xff] }
  0x63   :  { %1020 = vmatpush1.bf16.msra.mxu0 %v1019_v5  ;;  %v358_v5 = vld [vmem:[#allocation2 + $0x1b8] sm:$0xff] }
  0x64   :  { %1022 = vmatprep.subr.bf16.mxu0 %v1021_v6  ;;  %v1057_v6 = vpack.c.bf16 %v358_v5, %v356_v4  ;;  %v474_v4 = vld [vmem:[%s1727_s4 + $0x58] sm:$0xff] }
  0x67   :  { %1024 = vmatpush1.bf16.msra.mxu0 %v1023_v11  ;;  %v362_v11 = vld [vmem:[#allocation2 + $0x1d8] sm:$0xff] }
  0x68   :  { %1026 = vmatprep.subr.bf16.mxu0 %v1025_v12  ;;  %v359_v12 = vld [vmem:[#allocation2 + $0x1c0] sm:$0xff]  ;;  %v1061_v13 = vpack.c.bf16 %v362_v11, %v360_v10  ;;  %v476_v10 = vld [vmem:[%s1727_s4 + $0x68] sm:$0xff]  ;;  %v493_v11 = vld [vmem:[%s1727_s4 + $0xf0] sm:$0xff] }
  0x6b   :  { %1028 = vmatpush1.bf16.msra.mxu0 %v1027_v17  ;;  %v1063_v17 = vpack.c.bf16 %v361_v14, %v359_v12  ;;  %v494_v12 = vld [vmem:[%s1727_s4 + $0xf8] sm:$0xff] }
  0x6c   :  { %1030 = vmatprep.subr.bf16.mxu0 %v1029_v18  ;;  %v1065_v18 = vpack.c.bf16 %v366_v16, %v364_v15  ;;  %v1097_v14 = vpack.c.bf16 %v494_v12, %v493_v11  ;;  %v477_v15 = vld [vmem:[%s1727_s4 + $0x70] sm:$0xff]  ;;  %v478_v16 = vld [vmem:[%s1727_s4 + $0x78] sm:$0xff] }
  0x6d   :  { %v661_v12 = vld [vmem:[%s1729_s6 + $0x50] sm:$0xff] }
  0x6f   :  { %1032 = vmatpush1.bf16.msra.mxu0 %v1031_v23  ;;  %v480_v23 = vld [vmem:[%s1727_s4 + $0x88] sm:$0xff] }
  0x70   :  { %1034 = vmatprep.subr.bf16.mxu0 %v1033_v24  ;;  %v463_v24 = vld [vmem:[%s1727_s4] sm:$0xff]  ;;  %v1069_v25 = vpack.c.bf16 %v480_v23, %v479_v22  ;;  %v376_v22 = vrot.slane %v367_v19, %v375_v20 }
  0x72   :  { %1070 = vmatprep.subr.bf16.mxu1 %v1069_v25 }
  0x73   :  { %1036 = vmatpush1.bf16.msra.mxu0 %v1035_v29  ;;  %v1071_v29 = vpack.c.bf16 %v464_v26, %v463_v24 }
  0x74   :  { %1038 = vmatprep.subr.bf16.mxu0 %v1037_v30  ;;  %v1073_v30 = vpack.c.bf16 %v482_v28, %v481_v27 }
  0x77   :  { %1040 = vmatpush1.bf16.msra.mxu0 %v1039_v36  ;;  %v1075_v36 = vpack.c.bf16 %v466_v32, %v465_v31 }
  0x78   :  { %1042 = vmatprep.subr.bf16.mxu0 %v1041_v37  ;;  %v1077_v37 = vpack.c.bf16 %v484_v34, %v483_v33  ;;  %v572_v33 = vld [vmem:[%s1728_s5] sm:$0xff]  ;;  %v1205_v34 = vmov 0.0  }
  0x7b   :  { %1044 = vmatpush1.bf16.msra.mxu0 %v1043_v40  ;;  %v485_v40 = vld [vmem:[%s1727_s4 + $0xb0] sm:$0xff] }
  0x7c   :  { %1046 = vmatprep.subr.bf16.mxu0 %v1045_v54 }
  0x7f   :  { %1048 = vmatpush1.bf16.msra.mxu0 %v1047_v57 }
 0x129   :  { %v189_v41 = vpop.f32.mrb[0].mxu0 }
 0x12a   :  { %v191_v43 = vpop.f32.mrb[1].mxu0 }
 0x12b   :  { %v196_v44 = vcombine.low %v189_v41, %v191_v43  ;;  %v486_v41 = vld [vmem:[%s1727_s4 + $0xb8] sm:$0xff]  ;;  %v1079_v43 = vpack.c.bf16 %v468_v39, %v467_v38 }
 0x12d   :  { %v203_v45 = vrot.slane %v196_v44, %v1350_v42  ;;  %v1081_v44 = vpack.c.bf16 %v486_v41, %v485_v40  ;;  %v667_v41 = vld [vmem:[%s1729_s6 + $0x80] sm:$0xff] }
 0x12f   :  { %v1480_v46 = vsub.f32 %v1361_v47, %v203_v45  ;;  %v1049_v47 = vpack.c.bf16 %v350_v59, %v348_v58  ;;  %v469_v45 = vld [vmem:[%s1727_s4 + $0x30] sm:$0xff] }
 0x131   :  { %v206_v48 = vmul.f32 %v1480_v46, %v1480_v46  ;;  %1050 = vmatprep.subr.bf16.mxu0 %v1049_v47 }
 0x132   :  { %1052 = vmatpush1.bf16.msra.mxu0 %v1051_v61  ;;  %v488_v61 = vld [vmem:[%s1727_s4 + $0xc8] sm:$0xff] }
 0x133   :  { %v214_v49 = vrot.slane %v206_v48, %v1350_v42  ;;  %1054 = vmatprep.subr.bf16.mxu0 %v1053_v0  ;;  %v470_v48 = vld [vmem:[%s1727_s4 + $0x38] sm:$0xff]  ;;  %v489_v0 = vld [vmem:[%s1727_s4 + $0xd0] sm:$0xff] }
 0x134   :  { %v1089_v2 = vpack.c.bf16 %v490_v1, %v489_v0  ;;  %v657_v0 = vld [vmem:[%s1729_s6 + $0x30] sm:$0xff]  ;;  %v658_v1 = vld [vmem:[%s1729_s6 + $0x38] sm:$0xff] }
 0x135   :  { %v215_v51 = vcombine.high %v214_v49, %v214_v49 }
 0x136   :  { %1056 = vmatpush1.bf16.msra.mxu0 %v1055_v3  ;;  %v473_v3 = vld [vmem:[%s1727_s4 + $0x50] sm:$0xff] }
 0x137   :  { %282 = vmatprep.mubr.f32.mxu1 %v215_v51  ;;  %1058 = vmatprep.subr.bf16.mxu0 %v1057_v6  ;;  %v1091_v5 = vpack.c.bf16 %v474_v4, %v473_v3  ;;  %v491_v6 = vld [vmem:[%s1727_s4 + $0xe0] sm:$0xff]  ;;  %v676_v3 = vld [vmem:[%s1729_s6 + $0xc8] sm:$0xff]  ;;  %v1115_v4 = vpack.c.bf16 %v658_v1, %v657_v0 }
 0x138   :  { %283 = vmatmul.mubr.f32.vlgmr.msra.gmra.mrb[0].mxu1 %v214_v49  ;;  %v1083_v49 = vpack.c.bf16 %v470_v48, %v469_v45  ;;  %v652_v48 = vld [vmem:[%s1729_s6 + $0x8] sm:$0xff] }
 0x139   :  { %1072 = vmatpush3.bf16.msra.mxu1 %v1071_v29 }
 0x13a   :  { %1060 = vmatpush1.bf16.msra.mxu0 %v1059_v9  ;;  %1074 = vmatprep.subr.bf16.mxu1 %v1073_v30  ;;  %v1093_v9 = vpack.c.bf16 %v492_v7, %v491_v6  ;;  %v659_v6 = vld [vmem:[%s1729_s6 + $0x40] sm:$0xff]  ;;  %v660_v7 = vld [vmem:[%s1729_s6 + $0x48] sm:$0xff] }
 0x13b   :  { %1062 = vmatprep.subr.bf16.mxu0 %v1061_v13  ;;  %v1095_v13 = vpack.c.bf16 %v476_v10, %v475_v8  ;;  %v677_v8 = vld [vmem:[%s1729_s6 + $0xd0] sm:$0xff]  ;;  %v1119_v10 = vpack.c.bf16 %v660_v7, %v659_v6 }
 0x13d   :  { %1076 = vmatpush3.bf16.msra.mxu1 %v1075_v36 }
 0x13e   :  { %1064 = vmatpush1.bf16.msra.mxu0 %v1063_v17  ;;  %1078 = vmatprep.subr.bf16.mxu1 %v1077_v37  ;;  %v1099_v17 = vpack.c.bf16 %v478_v16, %v477_v15  ;;  %v680_v15 = vld [vmem:[%s1729_s6 + $0xe8] sm:$0xff] }
 0x13f   :  { %1066 = vmatprep.subr.bf16.mxu0 %v1065_v18  ;;  %v371_v18 = vsub.s32 0, %v1335_v35  ;;  %v573_v35 = vld [vmem:[%s1728_s5 + $0x8] sm:$0xff] }
 0x141   :  { %1080 = vmatpush3.bf16.msra.mxu1 %v1079_v43  ;;  %v668_v43 = vld [vmem:[%s1729_s6 + $0x88] sm:$0xff] }
 0x142   :  { %1068 = vmatpush1.bf16.msra.mxu0 %v1067_v21  ;;  %1082 = vmatprep.subr.bf16.mxu1 %v1081_v44  ;;  %v372_v21 = vrot.slane %v367_v19, %v371_v18  ;;  %v651_v44 = vld [vmem:[%s1729_s6] sm:$0xff]  ;;  %v1101_v45 = vpack.c.bf16 %v668_v43, %v667_v41  ;;  %v664_v19 = vld [vmem:[%s1729_s6 + $0x68] sm:$0xff] }
 0x143   :  { %v663_v18 = vld [vmem:[%s1729_s6 + $0x60] sm:$0xff] }
 0x144   :  { %v1127_v20 = vpack.c.bf16 %v664_v19, %v663_v18 }
 0x145   :  { %1084 = vmatpush3.bf16.msra.mxu1 %v1083_v49  ;;  %v669_v49 = vld [vmem:[%s1729_s6 + $0x90] sm:$0xff] }
 0x20b   :  { %v284_v51 = vpop.f32.mrb[0].mxu1 }
 0x20c   :  { %v285_v52 = vadd.f32 1e-12, %v284_v51  ;;  %v286_v53 = vpop.f32.mrb[1].mxu1  ;;  %v670_v51 = vld [vmem:[%s1729_s6 + $0x98] sm:$0xff] }
 0x20d   :  { %v287_v54 = vadd.f32 1e-12, %v286_v53  ;;  %v1105_v53 = vpack.c.bf16 %v670_v51, %v669_v49 }
 0x20e   :  { %1139 = vrsqrt.f32 %v285_v52  ;;  %v1103_v52 = vpack.c.bf16 %v652_v48, %v651_v44 }
 0x20f   :  { %1141 = vrsqrt.f32 %v287_v54  ;;  %v653_v54 = vld [vmem:[%s1729_s6 + $0x10] sm:$0xff] }
 0x218   :  { %v1140_v55 = vpop.eup %1139 }
 0x219   :  { %v1142_v56 = vpop.eup %1141 }
 0x21a   :  { %v293_v57 = vcombine.low %v1140_v55, %v1142_v56  ;;  %v654_v55 = vld [vmem:[%s1729_s6 + $0x18] sm:$0xff]  ;;  %v671_v56 = vld [vmem:[%s1729_s6 + $0xa0] sm:$0xff] }
 0x21c   :  { %v300_v58 = vrot.slane %v293_v57, %v1350_v42  ;;  %v672_v57 = vld [vmem:[%s1729_s6 + $0xa8] sm:$0xff] }
 0x21e   :  { %v302_v59 = vmul.f32 %v300_v58, %v1480_v46  ;;  %v1085_v46 = vpack.c.bf16 %v488_v61, %v487_v50  ;;  %v1107_v58 = vpack.c.bf16 %v654_v55, %v653_v54  ;;  %v655_v50 = vld [vmem:[%s1729_s6 + $0x20] sm:$0xff]  ;;  %v656_v61 = vld [vmem:[%s1729_s6 + $0x28] sm:$0xff] }
 0x220   :  { %v1536_v47 = vrot.slane %v302_v59, %v1350_v42  ;;  %v471_v42 = vld [vmem:[%s1727_s4 + $0x40] sm:$0xff]  ;;  %1086 = vmatprep.subr.bf16.mxu1 %v1085_v46  ;;  %v1109_v59 = vpack.c.bf16 %v672_v57, %v671_v56  ;;  %v673_v46 = vld [vmem:[%s1729_s6 + $0xb0] sm:$0xff] }
 0x221   :  { %v1087_v63 = vpack.c.bf16 %v472_v62, %v471_v42  ;;  %v674_v42 = vld [vmem:[%s1729_s6 + $0xb8] sm:$0xff]  ;;  %v1111_v62 = vpack.c.bf16 %v656_v61, %v655_v50 }
 0x222   :  { %v1540_v60 = vcombine.high %v1536_v47, %v1536_v47 }
 0x223   :  { %1088 = vmatpush3.bf16.msra.mxu1 %v1087_v63  ;;  %v1113_v63 = vpack.c.bf16 %v674_v42, %v673_v46 }
 0x224   :  { %454 = vmatprep.mubr.f32.mxu0 %v1540_v60  ;;  %1090 = vmatprep.subr.bf16.mxu1 %v1089_v2  ;;  %v675_v2 = vld [vmem:[%s1729_s6 + $0xc0] sm:$0xff] }
 0x225   :  { %455 = vmatmul.mubr.f32.vlgmr.msra.gmra.mrb[2].mxu0 %v1536_v47 }
 0x227   :  { %1092 = vmatpush3.bf16.msra.mxu1 %v1091_v5  ;;  %v1117_v5 = vpack.c.bf16 %v676_v3, %v675_v2 }
 0x228   :  { %1094 = vmatprep.subr.bf16.mxu1 %v1093_v9  ;;  %v678_v9 = vld [vmem:[%s1729_s6 + $0xd8] sm:$0xff] }
 0x229   :  { %v1121_v11 = vpack.c.bf16 %v678_v9, %v677_v8 }
 0x22b   :  { %1096 = vmatpush3.bf16.msra.mxu1 %v1095_v13  ;;  %v662_v13 = vld [vmem:[%s1729_s6 + $0x58] sm:$0xff] }
 0x22c   :  { %1098 = vmatprep.subr.bf16.mxu1 %v1097_v14  ;;  %v679_v14 = vld [vmem:[%s1729_s6 + $0xe0] sm:$0xff]  ;;  %v1123_v16 = vpack.c.bf16 %v662_v13, %v661_v12 }
 0x22f   :  { %1100 = vmatpush3.bf16.msra.mxu1 %v1099_v17  ;;  %v1125_v17 = vpack.c.bf16 %v680_v15, %v679_v14 }
 0x230   :  { %578 = vmatprep.subr.mxu1 %v573_v35 }
 0x2f8   :  { %v456_v23 = vpop.f32.mrb[2].mxu0 }
 0x2f9   :  { %v457_v24 = vadd.f32 %v456_v23, %v372_v21  ;;  %v458_v25 = vpop.f32.mrb[3].mxu0  ;;  %v681_v21 = vld [vmem:[%s1729_s6 + $0xf0] sm:$0xff] }
 0x2fa   :  { %v459_v26 = vadd.f32 %v458_v25, %v376_v22  ;;  %v682_v22 = vld [vmem:[%s1729_s6 + $0xf8] sm:$0xff] }
 0x2fb   :  { %v1129_v23 = vpack.c.bf16 %v682_v22, %v681_v21  ;;  %v666_v25 = vld [vmem:[%s1729_s6 + $0x78] sm:$0xff] }
 0x2fc   :  { %1143 = vtanh.f32 %v459_v26 }
 0x2fd   :  { %1145 = vtanh.f32 %v457_v24  ;;  %v665_v24 = vld [vmem:[%s1729_s6 + $0x70] sm:$0xff] }
 0x2fe   :  { %v1131_v26 = vpack.c.bf16 %v666_v25, %v665_v24 }
 0x306   :  { %v1144_v27 = vpop.eup %1143 }
 0x307   :  { %v1146_v28 = vpop.eup %1145  ;;  %559 = vmatprep.mubr.f32.mxu1 %v1144_v27 }
 0x308   :  { %560 = vmatmul.mubr.f32.vlgmr.msra.gmra.mrb[2].mxu1 %v1146_v28 }
 0x309   :  { %642 = vmatprep.mubr.f32.mxu1 %v1205_v34  ;;  %579 = vmatpush1.msra.mxu1 %v572_v33  ;;  %v805_v34 = vld [vmem:[%s1730_s7] ss:$0 sm:$0xff]  ;;  %s1206_s7 = smov [#allocation5]  }
 0x30a   :  { %1102 = vmatprep.subr.bf16.mxu1 %v1101_v45 }
 0x3db   :  { %v839_v29 = vpop.f32.mrb[2].mxu1 }
 0x3dc   :  { %v840_v30 = vpop.f32.mrb[3].mxu1 }
 0x3dd   :  { %v841_v31 = vadd.f32 %v840_v30, %v839_v29 }
 0x3df   :  { %v566_v32 = vsel %vm565_vm0, %v841_v31, -inf }
 0x3e0   :  { %567 = vmax.xlane.f32.xlu0 %v566_v32  ;;  %v806_v32 = vld [vmem:[%s1731_s8] ss:$0 sm:$0xff]  ;;  %s795_s8 = sshll.u32 %s1206_s7, 4  ;;  %s796_s8 = int_to_ptr.vmem [resolvable:$true] %s795_s8 }
 0x3e1   :  { %s1175_s24 = scalar_lea.vmem %s796_s8, 32  ;;  %p1180_p9 = scmp.lt.s32.totalorder %s796_s8, %s796_s8 }
 0x3e2   :  { %p1176_p8 = scmp.ne.s32.totalorder %s796_s8, %s1175_s24  ;;  %p1181_p10 = scmp.lt.s32.totalorder %s1175_s24, %s1175_s24 }
 0x3e4   :  { %p1182_p11 = por %p1181_p10, %p1180_p9 }
 0x3e6   :  { %p1183_p12 = pnand %p1182_p11, %p1176_p8 }
 0x46d   :  { %v568_v36 = vpop.xlane.xlu0 %567 }
 0x46e   :  { %v569_v37 = vsub.f32 %v841_v31, %v568_v36 }
 0x470   :  { %v570_v38 = vmul.f32 1.442695, %v569_v37 }
 0x472   :  { %1147 = vpow2.f32 %v570_v38 }
 0x47c   :  { %v1148_v39 = vpop.eup %1147 }
 0x47d   :  { %804 = vmatmul.mubr.msk.f32.vlgmr.msra.gmra.mrb[4].mxu1 %vm574_vm1, %v1148_v39  ;;  %v762_v40 = vsel %vm565_vm0, %v1148_v39, 0.0 }
 0x47e   :  { %763 = vadd.xlane.f32.xlu0 %v762_v40  ;;  %1104 = vmatpush3.bf16.msra.mxu1 %v1103_v52 }
 0x47f   :  { %1106 = vmatprep.subr.bf16.mxu1 %v1105_v53 }
 0x482   :  { %1108 = vmatpush3.bf16.msra.mxu1 %v1107_v58 }
 0x483   :  { %1110 = vmatprep.subr.bf16.mxu1 %v1109_v59 }
 0x486   :  { %1112 = vmatpush3.bf16.msra.mxu1 %v1111_v62 }
 0x487   :  { %1114 = vmatprep.subr.bf16.mxu1 %v1113_v63 }
 0x48a   :  { %1116 = vmatpush3.bf16.msra.mxu1 %v1115_v4 }
 0x48b   :  { %1118 = vmatprep.subr.bf16.mxu1 %v1117_v5 }
 0x48e   :  { %1120 = vmatpush3.bf16.msra.mxu1 %v1119_v10 }
 0x48f   :  { %1122 = vmatprep.subr.bf16.mxu1 %v1121_v11 }
 0x492   :  { %1124 = vmatpush3.bf16.msra.mxu1 %v1123_v16 }
 0x493   :  { %1126 = vmatprep.subr.bf16.mxu1 %v1125_v17 }
 0x496   :  { %1128 = vmatpush3.bf16.msra.mxu1 %v1127_v20 }
 0x497   :  { %1130 = vmatprep.subr.bf16.mxu1 %v1129_v23 }
 0x49a   :  { %1132 = vmatpush3.bf16.msra.mxu1 %v1131_v26 }
 0x50b   :  { %v764_v35 = vpop.xlane.xlu0 %763 }
 0x50c   :  { %v771_v37 = vmul.f32 %v806_v32, %v764_v35 }
 0x550   :  { %v644_v27 = vpop.f32.mrb[4].mxu1 }
 0x551   :  { %v646_v28 = vpop.f32.mrb[5].mxu1  ;;  %v649_v30 = vmul.f32 %v644_v27, %v1536_v47 }
 0x552   :  { %v650_v29 = vmul.f32 %v646_v28, %v1540_v60 }
 0x554   :  { %747 = vmatprep.mubr.f32.mxu1 %v650_v29 }
 0x555   :  { %748 = vmatmul.mubr.f32.vlgmr.msra.gmra.mrb[6].mxu1 %v649_v30 }
 0x628   :  { %v874_v31 = vpop.f32.mrb[6].mxu1 }
 0x629   :  { %v875_v33 = vpop.f32.mrb[7].mxu1 }
 0x62a   :  { %v876_v36 = vadd.f32 %v875_v33, %v874_v31 }
 0x62c   :  { %v760_v38 = vmul.f32 %v876_v36, %v805_v34 }
 0x62e   :  { %v772_v39 = vadd.f32 %v771_v37, %v760_v38 }
 0x630   :  { %v773_v60 = vmul.f32 %v772_v39, %v772_v39 }
 0x632   :  { %v775_v47 = vsel %vm774_vm2, %v773_v60, 0.0 }
 0x633   :  { %776 = vadd.xlane.f32.xlu1 %v775_v47 }
 0x6c0   :  { %v777_v40 = vpop.xlane.xlu1 %776 }
 0x6c1   :  { %1149 = vrsqrt.f32 %v777_v40  ;;  %vm780_vm3 = vcmp.eq.f32.partialorder %v777_v40, inf  ;;  %v783_v44 = vand.u32 2147483648, %v777_v40  ;;  %vm782_vm4 = vcmp.eq.f32.partialorder %v777_v40, 0.0 }
 0x6cb   :  { %v1150_v41 = vpop.eup %1149 }
 0x6cc   :  { %v779_v43 = vmul.f32 %v1150_v41, %v777_v40 }
 0x6ce   :  { %v781_v45 = vsel %vm780_vm3, %v777_v40, %v779_v43 }
 0x6cf   :  { %v784_v48 = vsel %vm782_vm4, %v783_v44, %v781_v45 }
 0x6d0   :  { %v785_v49 = vmax.f32 %v784_v48, 1e-12 }
 0x6d2   :  { %1151 = vrcp.f32 %v785_v49 }
 0x6dc   :  { %v1152_v51 = vpop.eup %1151 }
 0x6dd   :  { %v787_v52 = vmul.f32 %v1152_v51, %v772_v39 }
 0x6df   :  { %788 = vst.msk [vmem:[#allocation5] sm:$0x3] %vm774_vm2, %v787_v52 }
 0x6e0   :  { %1186 = shalt.err (!%p1183_p12)
}
 0x6e1   :  { %s1187_s27 = scalar_lea.hbm %s1732_s9, 32 }
 0x6e2   :  { %p1188_p13 = scmp.ne.s32.totalorder %s1732_s9, %s1187_s27  ;;  %p1191_p0 = scmp.lt.u32.totalorder %s1187_s27, %s1732_s9 }
 0x6e4   :  { %p1193_p1 = pnand %p1191_p0, %p1188_p13 }
 0x6e6   :  { %1196 = shalt.err (!%p1193_p1)
}
 0x6e7   :  { %798 = dma.vmem_to_hbm [thread:$0]  %s796_s8, 32, %s1732_s9, [#allocation4]  }
 0x6e8   :  { %1199 = dma.done.wait [#allocation4], 32  }
 0x6e9   :  { %1200 = vsyncadd [#allocation4], 4294967264 }
 0x6ea   :  { %802 = vsyncpa [#allocation3], 1 }
 0x6eb   :  { %803 = vsyncpa [#allocation4], 1 }

</bundles_post_ra>
